<compile_context>
chip_gen: v6e
topology: v6e:2x2x1
jax: 0.10.0
libtpu: 0.0.40
codegen_flags: <defaults>
</compile_context>

<pallas_src>
import functools

import jax
import jax.numpy as jnp
from jax import lax
from jax.experimental import pallas as pl
from jax.experimental.pallas import tpu as pltpu


def _round_up(x, m):
    return (x + m - 1) // m * m


def _tpu_info():
    try:
        return pltpu.get_tpu_info()
    except Exception:
        return None


def _vmem_limit_bytes(info):
    """Explicit scoped-VMEM limit; always returned (never None)."""
    if info is not None:
        cap = getattr(info, "vmem_capacity_bytes", None)
        if cap:
            # This kernel has no other large VMEM consumers: take 3/4 of the
            # chip (v5e/v6e: 96 of 128 MiB; v7x: 48 of 64 MiB).
            return int(min(cap * 3 // 4, 96 * 1024 * 1024))
    # Conservative fallback, still set explicitly: v5e's default scoped VMEM
    # is only 16 MiB, which pipeline buffers + f32 temporaries can exceed.
    return 32 * 1024 * 1024


def _is_v7x(info):
    """Best-effort detection of a 2-TensorCore chip (v7x)."""
    try:
        v = getattr(info, "chip_version", None) if info is not None else None
        if v is not None and "7" in str(v):
            return True
    except Exception:
        pass
    try:
        kind = jax.devices()[0].device_kind.lower()
        return ("v7" in kind) or ("7x" in kind)
    except Exception:
        return False


def _kl_kernel(x_ref, y_ref, o_ref, acc_ref, *, tb, nb, batch):
    b = pl.program_id(1)   # batch-tile index within the chunk ("arbitrary")

    @pl.when(b == 0)
    def _init():
        acc_ref[...] = jnp.zeros_like(acc_ref)

    x = x_ref[...].astype(jnp.float32)
    y = y_ref[...].astype(jnp.float32)

    # Stable logsumexp pieces along the class (lane) axis.
    x_max = jnp.max(x, axis=-1, keepdims=True)
    y_max = jnp.max(y, axis=-1, keepdims=True)
    x_sh = x - x_max
    y_sh = y - y_max

    ey = jnp.exp(y_sh)                                           # exp #1
    sum_y = jnp.sum(ey, axis=-1, keepdims=True)
    log_sum_x = jnp.log(jnp.sum(jnp.exp(x_sh), axis=-1,          # exp #2
                                keepdims=True))

    # Fused KL per row:
    #   sum_c q*(log q - log p)
    # = sum_c(ey*(y_sh - x_sh)) / sum_y + (log_sum_x - log(sum_y))
    # (the bias term's sum_c(ey)/sum_y cancels exactly -> no per-element add).
    dot = jnp.sum(ey * (y_sh - x_sh), axis=-1, keepdims=True)    # (tb, 1)
    bias = log_sum_x - jnp.log(sum_y)                            # (tb, 1)
    row_kl = dot * pl.reciprocal(sum_y, approx=False) + bias     # (tb, 1)

    # Mask rows beyond the true batch size.  Padded/overhang rows may hold
    # garbage (possibly inf/NaN within their own row), but every reduction so
    # far is per-row and jnp.where *selects* 0.0, so nothing propagates.
    tile_idx = pl.program_id(0) * nb + b         # UNclamped tile index
    row_ids = tile_idx * tb + lax.broadcasted_iota(jnp.int32, (tb, 1), 0)
    row_kl = jnp.where(row_ids < batch, row_kl, 0.0)

    # Single-vreg accumulator: cheap cross-sublane reduce per step.
    acc_ref[...] += jnp.sum(row_kl, axis=0, keepdims=True)

    @pl.when(b == nb - 1)
    def _finalize():
        # Lane-dense (1, 8, 128) output write, once per chunk.
        o_ref[...] = jnp.zeros(o_ref.shape, o_ref.dtype) + jnp.sum(acc_ref[...])


def kl_div_with_logits(x, y, *, num_parallel_chunks=None, max_tile_bytes=None):
    """x, y: (B, C) logits (f32/bf16/fp16). Returns scalar f32 loss.

    For best HBM-bound throughput on v5e/v6e, feed bf16 logits directly from
    the producer (the kernel upcasts to f32 in VMEM).
    """
    assert x.shape == y.shape and x.ndim == 2
    B, C = x.shape
    itemsize = jnp.dtype(x.dtype).itemsize

    info = _tpu_info()
    vmem_limit = _vmem_limit_bytes(info)

    if num_parallel_chunks is None:
        # The chunk axis only buys parallelism on 2-TC chips (v7x); on
        # single-TC v5e/v6e it is pure overhead.
        num_parallel_chunks = 2 if _is_v7x(info) else 1
    nc = max(1, min(int(num_parallel_chunks), 2))
    if B < nc * 8:
        nc = 1

    if max_tile_bytes is None:
        # Per-input-buffer cap tied to the VMEM limit (~12 MiB on 128 MiB
        # chips, ~6 MiB on v7x, 4 MiB on the fallback path).
        max_tile_bytes = max(2 * 1024 * 1024, vmem_limit // 8)

    # VMEM accounting per tile row:
    #   2 inputs x 2 pipeline buffers (input dtype)  -> 4 * C * itemsize
    #   ~5 live full-tile f32 temporaries in-kernel  -> 20 * C
    per_row_bytes = C * (4 * itemsize + 5 * 4)
    usable = int(vmem_limit * 0.75)      # headroom: acc, output, compiler scratch
    tb_budget = (usable // max(per_row_bytes, 1)) // 8 * 8
    tb_cap = (max_tile_bytes // max(C * itemsize, 1)) // 8 * 8
    tb = max(8, min(tb_budget, tb_cap, _round_up(B, 8)))

    if nc > 1:
        # Keep the tile count divisible by the chunk count so neither core
        # gets a clamped straggler tile (wasted DMA + compute, core imbalance).
        nt_target = _round_up(max(pl.cdiv(B, tb), nc), nc)
        tb = max(8, min(tb, _round_up(pl.cdiv(B, nt_target), 8)))

    nt_real = pl.cdiv(B, tb)             # tiles that contain real rows
    nt_grid = _round_up(nt_real, nc)     # grid tiles (>= nt_real)
    nb = nt_grid // nc

    def in_map(c, b):
        # Clamp is a safety net only: any overhang grid point re-reads a valid
        # tile whose rows are fully masked to 0 in-kernel.
        return (jnp.minimum(c * nb + b, nt_real - 1), 0)

    kernel = functools.partial(_kl_kernel, tb=tb, nb=nb, batch=B)

    # NOTE: pipeline_mode=pl.Buffered(3) on the input specs is a possible
    # cheap sweep on 128 MiB-VMEM chips; left at the default double-buffering.
    partials = pl.pallas_call(
        kernel,
        out_shape=jax.ShapeDtypeStruct((nc, 8, 128), jnp.float32),
        grid_spec=pltpu.PrefetchScalarGridSpec(
            num_scalar_prefetch=0,
            grid=(nc, nb),
            in_specs=[
                pl.BlockSpec((tb, C), in_map),
                pl.BlockSpec((tb, C), in_map),
            ],
            out_specs=pl.BlockSpec((1, 8, 128), lambda c, b: (c, 0, 0)),
            scratch_shapes=[pltpu.VMEM((1, 1), jnp.float32)],
        ),
        compiler_params=pltpu.CompilerParams(
            dimension_semantics=("parallel", "arbitrary"),
            vmem_limit_bytes=int(vmem_limit),
        ),
    )(x, y)

    # Sum the per-chunk partials and divide by batch size (x.size()[0]).
    return jnp.sum(partials[:, 0, 0]) / B


def _reference(x, y):
    # Pure-JAX reference of the PyTorch module.
    log_p = jax.nn.log_softmax(x.astype(jnp.float32), axis=1)
    q = jax.nn.softmax(y.astype(jnp.float32), axis=1)
    return jnp.sum(q * (jnp.log(q) - log_p)) / x.shape[0]


if __name__ == "__main__":
    key = jax.random.PRNGKey(0)
    k1, k2, k3, k4, k5, k6 = jax.random.split(key, 6)

    # Case 1: small classifier-style logits (batch=8, classes=32), single tile.
    B, C = 8, 32
    x = jax.random.normal(k1, (B, C), dtype=jnp.float32)
    y = jax.random.normal(k2, (B, C), dtype=jnp.float32)
    out = jax.block_until_ready(kl_div_with_logits(x, y))
    ref = jax.block_until_ready(_reference(x, y))
    assert jnp.allclose(out, ref, rtol=1e-4, atol=1e-5), (out, ref)

    # Case 2: non-divisible batch with small forced tiles and an explicit
    # 2-chunk split — exercises the multi-tile pipeline, the balanced
    # tile/chunk layout, and the row masking (runs on any chip).
    B2, C2 = 300, 128
    x2 = jax.random.normal(k3, (B2, C2), dtype=jnp.float32) * 3.0
    y2 = jax.random.normal(k4, (B2, C2), dtype=jnp.float32) * 3.0
    out2 = jax.block_until_ready(
        kl_div_with_logits(x2, y2, num_parallel_chunks=2,
                           max_tile_bytes=64 * 1024))
    ref2 = jax.block_until_ready(_reference(x2, y2))
    assert jnp.allclose(out2, ref2, rtol=1e-4, atol=1e-5), (out2, ref2)

    # Case 3: bf16 logits (producer-side half-width HBM traffic), chip-default
    # chunking and auto tile sizing.
    B3, C3 = 64, 256
    x3 = (jax.random.normal(k5, (B3, C3), dtype=jnp.float32) * 2.0).astype(jnp.bfloat16)
    y3 = (jax.random.normal(k6, (B3, C3), dtype=jnp.float32) * 2.0).astype(jnp.bfloat16)
    out3 = jax.block_until_ready(kl_div_with_logits(x3, y3))
    ref3 = jax.block_until_ready(_reference(x3, y3))
    assert jnp.allclose(out3, ref3, rtol=1e-4, atol=1e-5), (out3, ref3)

    print("KERNEL_OK")
</pallas_src>

<mosaic_0001>
module attributes {stable_mosaic.version = 11 : i64} {
  func.func @_kl_kernel(%arg0: i32, %arg1: i32, %arg2: memref<8x32xf32, #tpu.memory_space<vmem>>, %arg3: memref<8x32xf32, #tpu.memory_space<vmem>>, %arg4: memref<1x8x128xf32, #tpu.memory_space<vmem>>, %arg5: memref<1x1xf32, #tpu.memory_space<vmem>>) attributes {dimension_semantics = [#tpu.dimension_semantics<parallel>, #tpu.dimension_semantics<arbitrary>], iteration_bounds = array<i64: 1, 1>, scalar_prefetch = 0 : i64, scratch_operands = 1 : i64, tpu.core_type = #tpu.core_type<tc>, window_params = [{transform_indices = @transform_0, window_bounds = array<i64: 8, 32>}, {transform_indices = @transform_1, window_bounds = array<i64: 8, 32>}, {transform_indices = @transform_2, window_bounds = array<i64: 1, 8, 128>}]} {
    %c0_i32 = arith.constant 0 : i32
    %0 = arith.cmpi eq, %arg1, %c0_i32 : i32
    %1 = arith.extui %0 : i1 to i32
    %c0_i32_0 = arith.constant 0 : i32
    %2 = arith.cmpi ne, %1, %c0_i32_0 : i32
    scf.if %2 {
      %cst_17 = arith.constant 0.000000e+00 : f32
      %47 = vector.broadcast %cst_17 : f32 to vector<1x1xf32>
      %c0_18 = arith.constant 0 : index
      %c0_19 = arith.constant 0 : index
      %48 = vector.load %arg5[%c0_18, %c0_19] : memref<1x1xf32, #tpu.memory_space<vmem>>, vector<1x1xf32>
      tpu.vector_store %arg5[%c0_18, %c0_19], %47 {strides = array<i32>} : memref<1x1xf32, #tpu.memory_space<vmem>>, vector<1x1xf32>,
    } else {
    }
    %c0 = arith.constant 0 : index
    %c0_1 = arith.constant 0 : index
    %3 = vector.load %arg2[%c0, %c0_1] : memref<8x32xf32, #tpu.memory_space<vmem>>, vector<8x32xf32>
    %c0_2 = arith.constant 0 : index
    %c0_3 = arith.constant 0 : index
    %4 = vector.load %arg3[%c0_2, %c0_3] : memref<8x32xf32, #tpu.memory_space<vmem>>, vector<8x32xf32>
    %cst = arith.constant dense<0xFF800000> : vector<8xf32>
    %5 = vector.multi_reduction <maximumf>, %3, %cst [1] : vector<8x32xf32> to vector<8xf32>
    %6 = vector.shape_cast %5 : vector<8xf32> to vector<8x1xf32>
    %cst_4 = arith.constant dense<0xFF800000> : vector<8xf32>
    %7 = vector.multi_reduction <maximumf>, %4, %cst_4 [1] : vector<8x32xf32> to vector<8xf32>
    %8 = vector.shape_cast %7 : vector<8xf32> to vector<8x1xf32>
    %9 = vector.broadcast %6 : vector<8x1xf32> to vector<8x32xf32>
    %10 = arith.subf %3, %9 : vector<8x32xf32>
    %11 = vector.broadcast %8 : vector<8x1xf32> to vector<8x32xf32>
    %12 = arith.subf %4, %11 : vector<8x32xf32>
    %13 = math.exp %12 : vector<8x32xf32>
    %cst_5 = arith.constant dense<0.000000e+00> : vector<8xf32>
    %14 = vector.multi_reduction <add>, %13, %cst_5 [1] : vector<8x32xf32> to vector<8xf32>
    %15 = vector.shape_cast %14 : vector<8xf32> to vector<8x1xf32>
    %16 = math.exp %10 : vector<8x32xf32>
    %cst_6 = arith.constant dense<0.000000e+00> : vector<8xf32>
    %17 = vector.multi_reduction <add>, %16, %cst_6 [1] : vector<8x32xf32> to vector<8xf32>
    %18 = vector.shape_cast %17 : vector<8xf32> to vector<8x1xf32>
    %19 = math.log %18 : vector<8x1xf32>
    %20 = arith.subf %12, %10 : vector<8x32xf32>
    %21 = arith.mulf %13, %20 : vector<8x32xf32>
    %cst_7 = arith.constant dense<0.000000e+00> : vector<8xf32>
    %22 = vector.multi_reduction <add>, %21, %cst_7 [1] : vector<8x32xf32> to vector<8xf32>
    %23 = vector.shape_cast %22 : vector<8xf32> to vector<8x1xf32>
    %24 = math.log %15 : vector<8x1xf32>
    %25 = arith.subf %19, %24 : vector<8x1xf32>
    %26 = tpu.reciprocal %15 : vector<8x1xf32> -> vector<8x1xf32>
    %27 = arith.mulf %23, %26 : vector<8x1xf32>
    %28 = arith.addf %27, %25 : vector<8x1xf32>
    %c1_i32 = arith.constant 1 : i32
    %29 = arith.muli %arg0, %c1_i32 : i32
    %30 = arith.addi %29, %arg1 : i32
    %c8_i32 = arith.constant 8 : i32
    %31 = arith.muli %30, %c8_i32 : i32
    %32 = tpu.iota {dimensions = array<i32: 0>} : vector<8x1xi32>
    %33 = vector.broadcast %31 : i32 to vector<8x1xi32>
    %34 = arith.addi %33, %32 : vector<8x1xi32>
    %c8_i32_8 = arith.constant 8 : i32
    %35 = vector.broadcast %c8_i32_8 : i32 to vector<8x1xi32>
    %36 = arith.cmpi slt, %34, %35 : vector<8x1xi32>
    %cst_9 = arith.constant 0.000000e+00 : f32
    %37 = vector.broadcast %cst_9 : f32 to vector<8x1xf32>
    %38 = arith.select %36, %28, %37 : vector<8x1xi1>, vector<8x1xf32>
    %c0_10 = arith.constant 0 : index
    %c0_11 = arith.constant 0 : index
    %39 = vector.load %arg5[%c0_10, %c0_11] : memref<1x1xf32, #tpu.memory_space<vmem>>, vector<1x1xf32>
    %cst_12 = arith.constant dense<0.000000e+00> : vector<1xf32>
    %40 = vector.multi_reduction <add>, %38, %cst_12 [0] : vector<8x1xf32> to vector<1xf32>
    %41 = vector.shape_cast %40 : vector<1xf32> to vector<1x1xf32>
    %42 = arith.addf %39, %41 : vector<1x1xf32>
    %c0_13 = arith.constant 0 : index
    %c0_14 = arith.constant 0 : index
    %43 = vector.load %arg5[%c0_13, %c0_14] : memref<1x1xf32, #tpu.memory_space<vmem>>, vector<1x1xf32>
    tpu.vector_store %arg5[%c0_13, %c0_14], %42 {strides = array<i32>} : memref<1x1xf32, #tpu.memory_space<vmem>>, vector<1x1xf32>,
    %c0_i32_15 = arith.constant 0 : i32
    %44 = arith.cmpi eq, %arg1, %c0_i32_15 : i32
    %45 = arith.extui %44 : i1 to i32
    %c0_i32_16 = arith.constant 0 : i32
    %46 = arith.cmpi ne, %45, %c0_i32_16 : i32
    scf.if %46 {
      %cst_17 = arith.constant 0.000000e+00 : f32
      %47 = vector.broadcast %cst_17 : f32 to vector<1x8x128xf32>
      %c0_18 = arith.constant 0 : index
      %c0_19 = arith.constant 0 : index
      %48 = vector.load %arg5[%c0_18, %c0_19] : memref<1x1xf32, #tpu.memory_space<vmem>>, vector<1x1xf32>
      %49 = vector.shape_cast %48 : vector<1x1xf32> to vector<1x1x1xf32>
      %cst_20 = arith.constant dense<0.000000e+00> : vector<1xf32>
      %50 = vector.multi_reduction <add>, %49, %cst_20 [1, 2] : vector<1x1x1xf32> to vector<1xf32>
      %51 = vector.shape_cast %50 : vector<1xf32> to vector<1x1x1xf32>
      %52 = vector.extract %51[0, 0, 0] : f32 from vector<1x1x1xf32>
      %53 = vector.broadcast %52 : f32 to vector<1x8x128xf32>
      %54 = arith.addf %47, %53 : vector<1x8x128xf32>
      %c0_21 = arith.constant 0 : index
      %c0_22 = arith.constant 0 : index
      %c0_23 = arith.constant 0 : index
      %55 = vector.load %arg4[%c0_21, %c0_22, %c0_23] : memref<1x8x128xf32, #tpu.memory_space<vmem>>, vector<1x8x128xf32>
      tpu.vector_store %arg4[%c0_21, %c0_22, %c0_23], %54 {strides = array<i32>} : memref<1x8x128xf32, #tpu.memory_space<vmem>>, vector<1x8x128xf32>,
    } else {
    }
    return
  }
  func.func @transform_0(%arg0: i32, %arg1: i32) -> (i32, i32) {
    %c1_i32 = arith.constant 1 : i32
    %0 = arith.muli %arg0, %c1_i32 : i32
    %1 = arith.addi %0, %arg1 : i32
    %c0_i32 = arith.constant 0 : i32
    %2 = arith.minsi %1, %c0_i32 : i32
    %c0_i32_0 = arith.constant 0 : i32
    %c0_i32_1 = arith.constant 0 : i32
    return %2, %c0_i32_0 : i32, i32
  }
  func.func @transform_1(%arg0: i32, %arg1: i32) -> (i32, i32) {
    %c1_i32 = arith.constant 1 : i32
    %0 = arith.muli %arg0, %c1_i32 : i32
    %1 = arith.addi %0, %arg1 : i32
    %c0_i32 = arith.constant 0 : i32
    %2 = arith.minsi %1, %c0_i32 : i32
    %c0_i32_0 = arith.constant 0 : i32
    %c0_i32_1 = arith.constant 0 : i32
    return %2, %c0_i32_0 : i32, i32
  }
  func.func @transform_2(%arg0: i32, %arg1: i32) -> (i32, i32, i32) {
    %c0_i32 = arith.constant 0 : i32
    %c0_i32_0 = arith.constant 0 : i32
    %c0_i32_1 = arith.constant 0 : i32
    return %arg0, %c0_i32, %c0_i32_0 : i32, i32, i32
  }
}

</mosaic_0001>

<bundles_post_ra>
// kernel: tpu_custom_call.1
= control target key start
LH: loop header
LB: loop body
LE: loop exit
PB: predicated region body
PF: predicated region fallthrough
CT: control target
= control target key end

     0   :  { %7 = vsyncpa [#allocation4], 0  ;;  %s256_s0 = inlined_call_operand.hbm [shape: f32[8,32], index: 0, kind: input, shape index: {}]   ;;  %s257_s1 = inlined_call_operand.hbm [shape: f32[8,32], index: 1, kind: input, shape index: {}]   ;;  %s258_s2 = inlined_call_operand.hbm [shape: f32[1,8,128], index: 2, kind: output, shape index: {}]  }
   0x1   :  { %8 = vsyncpa [#allocation7], 0 }
   0x2   :  { %9 = vsyncpa [#allocation5], 0  ;;  %s221_s9 = smov [#allocation3]   ;;  %s222_s11 = smov [#allocation6]  }
   0x3   :  { %s21_s10 = sshll.u32 %s221_s9, 4  ;;  %s36_s12 = sshll.u32 %s222_s11, 4  ;;  %s22_s10 = int_to_ptr.vmem [resolvable:$true] %s21_s10  ;;  %s37_s12 = int_to_ptr.vmem [resolvable:$true] %s36_s12 }
   0x4   :  { %s163_s13 = scalar_lea.vmem %s22_s10, 128  ;;  %p168_p1 = scmp.lt.s32.totalorder %s22_s10, %s22_s10 }
   0x5   :  { %p164_p0 = scmp.ne.s32.totalorder %s22_s10, %s163_s13  ;;  %p169_p2 = scmp.lt.s32.totalorder %s163_s13, %s163_s13 }
   0x7   :  { %p170_p3 = por %p169_p2, %p168_p1 }
   0x9   :  { %p171_p4 = pnand %p170_p3, %p164_p0 }
   0xb   :  { %174 = shalt.err (!%p171_p4)
}
   0xc   :  { %24 = dma.hbm_to_vmem [thread:$0]  %s256_s0, 128, %s22_s10, [#allocation4]  }
   0xd   :  { %s183_s16 = scalar_lea.vmem %s37_s12, 128  ;;  %p188_p6 = scmp.lt.s32.totalorder %s37_s12, %s37_s12 }
   0xe   :  { %p184_p5 = scmp.ne.s32.totalorder %s37_s12, %s183_s16  ;;  %p189_p7 = scmp.lt.s32.totalorder %s183_s16, %s183_s16 }
  0x10   :  { %p190_p8 = por %p189_p7, %p188_p6 }
  0x12   :  { %p191_p9 = pnand %p190_p8, %p184_p5 }
  0x14   :  { %194 = shalt.err (!%p191_p9)
}
  0x15   :  { %39 = dma.hbm_to_vmem [thread:$0]  %s257_s1, 128, %s37_s12, [#allocation7]  }
  0x16   :  { %215 = dma.done.wait [#allocation4], 128  }
  0x17   :  { %216 = vsyncadd [#allocation4], 4294967168 }
  0x18   :  { %217 = dma.done.wait [#allocation7], 128  }
  0x19   :  { %218 = vsyncadd [#allocation7], 4294967168  ;;  %vm56_vm0 = vcmask 0   ;;  %v223_v0 = vmov 0.0   ;;  %vm60_vm1 = vcmask 261120   ;;  %v58_v1 = vld [vmem:[#allocation3] sm:$0xff] }
  0x1a   :  { %57 = vst.msk [vmem:[#allocation2] sm:$0x1] %vm56_vm0, %v223_v0  ;;  %v59_v2 = vld [vmem:[#allocation6] sm:$0xff]  ;;  %v61_v3 = vsel %vm60_vm1, %v58_v1, -inf  ;;  %s224_s0 = smov [#allocation8]  }
  0x1b   :  { %62 = vmax.xlane.f32.xlu0 %v61_v3  ;;  %v64_v4 = vsel %vm60_vm1, %v59_v2, -inf  ;;  %s125_s1 = sshll.u32 %s224_s0, 4  ;;  %s126_s1 = int_to_ptr.vmem [resolvable:$true] %s125_s1 }
  0x1c   :  { %s195_s20 = scalar_lea.vmem %s126_s1, 128  ;;  %p200_p11 = scmp.lt.s32.totalorder %s126_s1, %s126_s1 }
  0x1d   :  { %p196_p10 = scmp.ne.s32.totalorder %s126_s1, %s195_s20  ;;  %p201_p12 = scmp.lt.s32.totalorder %s195_s20, %s195_s20 }
  0x1f   :  { %65 = vmax.xlane.f32.xlu0 %v64_v4  ;;  %p202_p13 = por %p201_p12, %p200_p11 }
  0x21   :  { %v100_v34 = vld [vmem:[#allocation2] sm:$0x1]  ;;  %p203_p0 = pnand %p202_p13, %p196_p10 }
  0xa4   :  { %v63_v5 = vpop.xlane.xlu0 %62 }
  0xa5   :  { %v67_v6 = vsub.f32 %v58_v1, %v63_v5 }
  0xa7   :  { %v74_v9 = vmul.f32 1.442695, %v67_v6 }
  0xa8   :  { %v66_v7 = vpop.xlane.xlu0 %65 }
  0xa9   :  { %v68_v8 = vsub.f32 %v59_v2, %v66_v7 }
  0xab   :  { %v69_v10 = vmul.f32 1.442695, %v68_v8  ;;  %v81_v11 = vsub.f32 %v68_v8, %v67_v6 }
  0xad   :  { %145 = vpow2.f32 %v69_v10 }
  0xae   :  { %147 = vpow2.f32 %v74_v9 }
  0xba   :  { %v146_v12 = vpop.eup %145 }
  0xbb   :  { %v71_v13 = vsel %vm60_vm1, %v146_v12, 0.0  ;;  %v82_v14 = vmul.f32 %v146_v12, %v81_v11  ;;  %v148_v15 = vpop.eup %147 }
  0xbc   :  { %72 = vadd.xlane.f32.xlu1 %v71_v13  ;;  %v76_v17 = vsel %vm60_vm1, %v148_v15, 0.0 }
  0xbd   :  { %v83_v16 = vsel %vm60_vm1, %v82_v14, 0.0 }
  0xbe   :  { %84 = vadd.xlane.f32.xlu0 %v83_v16 }
  0xc0   :  { %77 = vadd.xlane.f32.xlu1 %v76_v17 }
 0x145   :  { %v73_v18 = vpop.xlane.xlu1 %72 }
 0x146   :  { %149 = vlog2.f32 %v73_v18 }
 0x147   :  { %151 = vrcp.f32 %v73_v18  ;;  %v85_v25 = vpop.xlane.xlu0 %84 }
 0x149   :  { %v78_v19 = vpop.xlane.xlu1 %77 }
 0x14a   :  { %153 = vlog2.f32 %v78_v19 }
 0x153   :  { %v150_v20 = vpop.eup %149 }
 0x154   :  { %v152_v21 = vpop.eup %151  ;;  %v87_v23 = vmul.f32 0.6931472, %v150_v20 }
 0x155   :  { %v90_v26 = vmul.f32 %v152_v21, %v85_v25 }
 0x157   :  { %v154_v22 = vpop.eup %153 }
 0x158   :  { %v80_v24 = vmul.f32 0.6931472, %v154_v22 }
 0x15a   :  { %v88_v27 = vsub.f32 %v80_v24, %v87_v23 }
 0x15c   :  { %v91_v28 = vadd.f32 %v90_v26, %v88_v27 }
 0x15e   :  { %v101_v29 = vrot.slane %v91_v28, 4 }
 0x160   :  { %v102_v30 = vadd.f32 %v101_v29, %v91_v28 }
 0x162   :  { %v103_v31 = vrot.slane %v102_v30, 2 }
 0x164   :  { %v104_v32 = vadd.f32 %v103_v31, %v102_v30 }
 0x166   :  { %v105_v33 = vrot.slane %v104_v32, 1 }
 0x168   :  { %v106_v35 = vadd.f32 %v105_v33, %v104_v32 }
 0x16a   :  { %v107_v36 = vadd.f32 %v106_v35, %v100_v34 }
 0x16c   :  { %109 = vst.msk [vmem:[#allocation2] sm:$0x1] %vm56_vm0, %v107_v36 }
 0x173   :  { %v113_v37 = vld [vmem:[#allocation2] sm:$0x1] }
 0x174   :  { %139 = vpush %v113_v37 }
 0x1a5   :  { %s140_s19 = spop %139 }
 0x1a6   :  { %v116_v38 = vstv %s140_s19 }
 0x1a7   :  { %118 = vst [vmem:[#allocation8] sm:$0xff] %v116_v38 }
 0x1a8   :  { %206 = shalt.err (!%p203_p0)
}
 0x1a9   :  { %128 = dma.vmem_to_hbm [thread:$0]  %s126_s1, 128, %s258_s2, [#allocation5]  }
 0x1aa   :  { %219 = dma.done.wait [#allocation5], 128  }
 0x1ab   :  { %220 = vsyncadd [#allocation5], 4294967168 }
 0x1ac   :  { %132 = vsyncpa [#allocation4], 1 }
 0x1ad   :  { %133 = vsyncpa [#allocation7], 1 }
 0x1ae   :  { %134 = vsyncpa [#allocation5], 1 }

</bundles_post_ra>
